<compile_context>
chip_gen: v6e
topology: v6e:2x2x1
jax: 0.10.0
libtpu: 0.0.40
codegen_flags: <defaults>
</compile_context>

<pallas_src>
import jax
import jax.numpy as jnp
from jax import lax
from jax.experimental import pallas as pl
from jax.experimental.pallas import tpu as pltpu


def _round_up(x, m):
    return ((x + m - 1) // m) * m


def _chip_params():
    """Per-generation (target tile bytes, VMEM limit cap, has 2 TensorCores)."""
    try:
        kind = jax.devices()[0].device_kind.lower()
    except Exception:  # pragma: no cover - defensive
        kind = ""
    if "v7" in kind:
        # 3.2 TB/s HBM: amortize the ~0.35us/step overhead; 4x8MiB double-buffered
        # in+out still fits the 64 MiB physical VMEM.
        return 8 << 20, 48 << 20, True
    # v5e / v6e: single TC, 128 MiB physical VMEM.
    return 4 << 20, 96 << 20, False


def _choose_block_b(B, D, itemsize, target_bytes, sub, two_tc):
    """Row-tile size: sublane-aligned, ~target_bytes per input tile."""
    max_rows = max(sub, (target_bytes // max(1, D * itemsize)) // sub * sub)
    block_b = min(max_rows, _round_up(B, sub))
    # Only force a 2-way split when there are actually 2 TensorCores to feed.
    if two_tc and block_b >= B and B >= 2 * sub:
        block_b = _round_up(pl.cdiv(B, 2), sub)
    return block_b


# --------------------------------------------------------------------------- #
# Main (row-tiled) path: one pass, whole latent dim per tile.
# --------------------------------------------------------------------------- #
def _ball_project_kernel(x_ref, o_ref):
    # x_ref: (block_b, D) tile in VMEM.  Garbage OOB rows (overhanging last
    # block) are harmless: the reduction is per-row and their writes are masked.
    xf = x_ref[...].astype(jnp.float32)
    msq = jnp.mean(xf * xf, axis=-1, keepdims=True)   # (block_b, 1), f32 accumulate
    inv = lax.rsqrt(msq + 1e-8)                       # EUP rsqrt
    o_ref[...] = (xf * inv).astype(o_ref.dtype)       # f32 mul, single cast at store


# --------------------------------------------------------------------------- #
# Wide-D fallback: lane-tiled two-pass (sum-of-squares accumulate, then scale).
# --------------------------------------------------------------------------- #
def _ball_project_two_pass(x, *, block_b, block_d, vmem_cap, two_tc):
    B, D = x.shape
    itemsize = jnp.dtype(x.dtype).itemsize
    nb = pl.cdiv(B, block_b)
    nd = pl.cdiv(D, block_d)

    tile_bytes = block_b * block_d * itemsize
    vmem_limit = int(min(vmem_cap, max(32 << 20, 4 * tile_bytes + (4 << 20))))
    need_mask = (D % block_d) != 0

    # Pass 1: per-row sum of squares, accumulated over the lane-tiled axis.
    def sumsq_kernel(x_ref, ss_ref):
        d = pl.program_id(1)
        xf = x_ref[...].astype(jnp.float32)
        if need_mask:
            lane = lax.broadcasted_iota(jnp.int32, xf.shape, 1) + d * block_d
            xf = jnp.where(lane < D, xf, 0.0)   # zero OOB lanes of the last d block
        partial = jnp.sum(xf * xf, axis=-1, keepdims=True)

        @pl.when(d == 0)
        def _():
            ss_ref[...] = partial

        @pl.when(d > 0)
        def _():
            ss_ref[...] = ss_ref[...] + partial

    ss = pl.pallas_call(
        sumsq_kernel,
        out_shape=jax.ShapeDtypeStruct((B, 1), jnp.float32),
        grid_spec=pltpu.PrefetchScalarGridSpec(
            num_scalar_prefetch=0,
            grid=(nb, nd),
            in_specs=[pl.BlockSpec((block_b, block_d), lambda i, j: (i, j))],
            out_specs=pl.BlockSpec((block_b, 1), lambda i, j: (i, 0)),
        ),
        compiler_params=pltpu.CompilerParams(
            dimension_semantics=("parallel", "arbitrary"),
            vmem_limit_bytes=vmem_limit,
        ),
    )(x)

    # Pass 2: scale each tile by rsqrt(mean + eps).
    inv_d = 1.0 / D

    def scale_kernel(x_ref, ss_ref, o_ref):
        xf = x_ref[...].astype(jnp.float32)
        inv = lax.rsqrt(ss_ref[...] * inv_d + 1e-8)
        o_ref[...] = (xf * inv).astype(o_ref.dtype)

    return pl.pallas_call(
        scale_kernel,
        out_shape=jax.ShapeDtypeStruct((B, D), x.dtype),
        grid_spec=pltpu.PrefetchScalarGridSpec(
            num_scalar_prefetch=0,
            grid=(nb, nd),
            in_specs=[pl.BlockSpec((block_b, block_d), lambda i, j: (i, j)),
                      pl.BlockSpec((block_b, 1), lambda i, j: (i, 0))],
            out_specs=pl.BlockSpec((block_b, block_d), lambda i, j: (i, j)),
        ),
        compiler_params=pltpu.CompilerParams(
            dimension_semantics=("parallel", "parallel"),
            vmem_limit_bytes=vmem_limit,
        ),
    )(x, ss)


# --------------------------------------------------------------------------- #
# Public wrapper.
# --------------------------------------------------------------------------- #
def ball_project(x):
    """x: (B, D) array. Returns x / sqrt(mean(x^2, dim=1, keepdim=True) + 1e-8)."""
    B, D = x.shape
    itemsize = jnp.dtype(x.dtype).itemsize
    sub = {4: 8, 2: 16, 1: 32}.get(itemsize, 8)         # sublane packing per dtype
    target_bytes, vmem_cap, two_tc = _chip_params()

    # Wide-D guard: even a minimum-rows tile (double-buffered in+out) would blow
    # the VMEM budget -> lane-tiled two-pass path.
    min_tile_bytes = sub * D * itemsize
    if 4 * min_tile_bytes + (4 << 20) > vmem_cap:
        block_d = max(128, (target_bytes // (sub * itemsize)) // 128 * 128)
        block_d = min(block_d, _round_up(D, 128))
        return _ball_project_two_pass(x, block_b=sub, block_d=block_d,
                                      vmem_cap=vmem_cap, two_tc=two_tc)

    block_b = _choose_block_b(B, D, itemsize, target_bytes, sub, two_tc)
    grid_steps = pl.cdiv(B, block_b)

    tile_bytes = block_b * D * itemsize
    vmem_limit = int(min(vmem_cap, max(32 << 20, 4 * tile_bytes + (4 << 20))))

    # Only reach for CORE_PARALLEL on 2-TC chips with an even, >=2 step count;
    # elsewhere the measured difference vs "parallel" is nil.
    batch_sem = "parallel"
    if two_tc and grid_steps >= 2 and grid_steps % 2 == 0 and hasattr(pltpu, "CORE_PARALLEL"):
        batch_sem = pltpu.CORE_PARALLEL

    return pl.pallas_call(
        _ball_project_kernel,
        out_shape=jax.ShapeDtypeStruct((B, D), x.dtype),
        grid_spec=pltpu.PrefetchScalarGridSpec(
            num_scalar_prefetch=0,
            grid=(grid_steps,),
            in_specs=[pl.BlockSpec((block_b, D), lambda i: (i, 0))],
            out_specs=pl.BlockSpec((block_b, D), lambda i: (i, 0)),
        ),
        compiler_params=pltpu.CompilerParams(
            dimension_semantics=(batch_sem,),
            vmem_limit_bytes=vmem_limit,
        ),
    )(x)


def ball_project_ref(x):
    # Pure-JAX reference replicating the PyTorch module exactly.
    xf = x.astype(jnp.float32)
    msq = jnp.mean(jnp.square(xf), axis=1, keepdims=True)
    return (xf / jnp.sqrt(msq + 1e-8)).astype(x.dtype)


if __name__ == "__main__":
    # Small latent-vector batch; D = latent_code_size.
    x = jax.random.normal(jax.random.PRNGKey(0), (8, 128), dtype=jnp.float32)
    y = jax.block_until_ready(ball_project(x))
    assert jnp.allclose(y, ball_project_ref(x), atol=1e-5, rtol=1e-5), "mismatch (8x128)"

    # Ragged batch / non-128 latent dim exercises the overhanging-block path (no pad/slice).
    x2 = jax.random.normal(jax.random.PRNGKey(1), (10, 96), dtype=jnp.float32)
    y2 = jax.block_until_ready(ball_project(x2))
    assert jnp.allclose(y2, ball_project_ref(x2), atol=1e-5, rtol=1e-5), "mismatch (10x96)"

    # Exercise the wide-D two-pass fallback at a small shape (forced block sizes):
    # ragged batch + lane masking on the last d block.
    x3 = jax.random.normal(jax.random.PRNGKey(2), (10, 320), dtype=jnp.float32)
    y3 = jax.block_until_ready(
        _ball_project_two_pass(x3, block_b=8, block_d=128, vmem_cap=48 << 20, two_tc=False))
    assert jnp.allclose(y3, ball_project_ref(x3), atol=1e-5, rtol=1e-5), "mismatch (two-pass)"

    print("KERNEL_OK")
</pallas_src>

<mosaic_0001>
module attributes {stable_mosaic.version = 11 : i64} {
  func.func @_ball_project_kernel(%arg0: i32, %arg1: memref<8x128xf32, #tpu.memory_space<vmem>>, %arg2: memref<8x128xf32, #tpu.memory_space<vmem>>) attributes {dimension_semantics = [#tpu.dimension_semantics<parallel>], iteration_bounds = array<i64: 1>, scalar_prefetch = 0 : i64, scratch_operands = 0 : i64, tpu.core_type = #tpu.core_type<tc>, window_params = [{transform_indices = @transform_0, window_bounds = array<i64: 8, 128>}, {transform_indices = @transform_1, window_bounds = array<i64: 8, 128>}]} {
    %c0 = arith.constant 0 : index
    %c0_0 = arith.constant 0 : index
    %0 = vector.load %arg1[%c0, %c0_0] : memref<8x128xf32, #tpu.memory_space<vmem>>, vector<8x128xf32>
    %1 = arith.mulf %0, %0 : vector<8x128xf32>
    %cst = arith.constant dense<0.000000e+00> : vector<8xf32>
    %2 = vector.multi_reduction <add>, %1, %cst [1] : vector<8x128xf32> to vector<8xf32>
    %3 = vector.shape_cast %2 : vector<8xf32> to vector<8x1xf32>
    %cst_1 = arith.constant 1.280000e+02 : f32
    %4 = vector.broadcast %cst_1 : f32 to vector<8x1xf32>
    %5 = arith.divf %3, %4 : vector<8x1xf32>
    %cst_2 = arith.constant 9.99999993E-9 : f32
    %6 = vector.broadcast %cst_2 : f32 to vector<8x1xf32>
    %7 = arith.addf %5, %6 : vector<8x1xf32>
    %8 = math.rsqrt %7 : vector<8x1xf32>
    %9 = vector.broadcast %8 : vector<8x1xf32> to vector<8x128xf32>
    %10 = arith.mulf %0, %9 : vector<8x128xf32>
    %c0_3 = arith.constant 0 : index
    %c0_4 = arith.constant 0 : index
    %11 = vector.load %arg2[%c0_3, %c0_4] : memref<8x128xf32, #tpu.memory_space<vmem>>, vector<8x128xf32>
    tpu.vector_store %arg2[%c0_3, %c0_4], %10 {strides = array<i32>} : memref<8x128xf32, #tpu.memory_space<vmem>>, vector<8x128xf32>,
    return
  }
  func.func @transform_0(%arg0: i32) -> (i32, i32) {
    %c0_i32 = arith.constant 0 : i32
    %c0_i32_0 = arith.constant 0 : i32
    return %arg0, %c0_i32 : i32, i32
  }
  func.func @transform_1(%arg0: i32) -> (i32, i32) {
    %c0_i32 = arith.constant 0 : i32
    %c0_i32_0 = arith.constant 0 : i32
    return %arg0, %c0_i32 : i32, i32
  }
}

</mosaic_0001>

<bundles_post_ra>
// kernel: tpu_custom_call.1
= control target key start
LH: loop header
LB: loop body
LE: loop exit
PB: predicated region body
PF: predicated region fallthrough
CT: control target
= control target key end

     0   :  { %6 = vsyncpa [#allocation3], 0  ;;  %s112_s0 = inlined_call_operand.hbm [shape: f32[8,128], index: 0, kind: input, shape index: {}]   ;;  %s113_s1 = inlined_call_operand.hbm [shape: f32[8,128], index: 1, kind: output, shape index: {}]  }
   0x1   :  { %7 = vsyncpa [#allocation4], 0  ;;  %s94_s6 = smov [#allocation2]  }
   0x2   :  { %s14_s7 = sshll.u32 %s94_s6, 4  ;;  %s15_s7 = int_to_ptr.vmem [resolvable:$true] %s14_s7 }
   0x3   :  { %s58_s8 = scalar_lea.vmem %s15_s7, 128  ;;  %p63_p1 = scmp.lt.s32.totalorder %s15_s7, %s15_s7 }
   0x4   :  { %p59_p0 = scmp.ne.s32.totalorder %s15_s7, %s58_s8  ;;  %p64_p2 = scmp.lt.s32.totalorder %s58_s8, %s58_s8 }
   0x6   :  { %p65_p3 = por %p64_p2, %p63_p1 }
   0x8   :  { %p66_p4 = pnand %p65_p3, %p59_p0 }
   0xa   :  { %69 = shalt.err (!%p66_p4)
}
   0xb   :  { %17 = dma.hbm_to_vmem [thread:$0]  %s112_s0, 128, %s15_s7, [#allocation3]  }
   0xc   :  { %90 = dma.done.wait [#allocation3], 128  }
   0xd   :  { %91 = vsyncadd [#allocation3], 4294967168  ;;  %v21_v0 = vld [vmem:[#allocation2] sm:$0xff]  ;;  %s95_s11 = smov [#allocation5]  }
   0xe   :  { %v22_v1 = vmul.f32 %v21_v0, %v21_v0  ;;  %s37_s12 = sshll.u32 %s95_s11, 4  ;;  %s38_s12 = int_to_ptr.vmem [resolvable:$true] %s37_s12 }
   0xf   :  { %s70_s13 = scalar_lea.vmem %s38_s12, 128  ;;  %p75_p6 = scmp.lt.s32.totalorder %s38_s12, %s38_s12 }
  0x10   :  { %23 = vadd.xlane.f32.xlu0 %v22_v1  ;;  %p71_p5 = scmp.ne.s32.totalorder %s38_s12, %s70_s13  ;;  %p76_p7 = scmp.lt.s32.totalorder %s70_s13, %s70_s13 }
  0x12   :  { %p77_p8 = por %p76_p7, %p75_p6 }
  0x14   :  { %p78_p9 = pnand %p77_p8, %p71_p5 }
  0x99   :  { %v24_v2 = vpop.xlane.xlu0 %23 }
  0x9a   :  { %v26_v3 = vmul.f32 0.0078125, %v24_v2 }
  0x9c   :  { %v27_v4 = vadd.f32 1e-08, %v26_v3 }
  0x9e   :  { %48 = vrsqrt.f32 %v27_v4 }
  0xab   :  { %v49_v5 = vpop.eup %48 }
  0xac   :  { %v29_v6 = vmul.f32 %v49_v5, %v21_v0 }
  0xae   :  { %30 = vst [vmem:[#allocation5] sm:$0xff] %v29_v6 }
  0xaf   :  { %81 = shalt.err (!%p78_p9)
}
  0xb0   :  { %40 = dma.vmem_to_hbm [thread:$0]  %s38_s12, 128, %s113_s1, [#allocation4]  }
  0xb1   :  { %92 = dma.done.wait [#allocation4], 128  }
  0xb2   :  { %93 = vsyncadd [#allocation4], 4294967168 }
  0xb3   :  { %44 = vsyncpa [#allocation3], 1 }
  0xb4   :  { %45 = vsyncpa [#allocation4], 1 }

</bundles_post_ra>
